<compile_context>
chip_gen: v6e
topology: v6e:2x2x1
jax: 0.10.0
libtpu: 0.0.40
codegen_flags: <defaults>
</compile_context>

<pallas_src>
import functools

import jax
import jax.numpy as jnp
from jax.experimental import pallas as pl
from jax.experimental.pallas import tpu as pltpu

_LANE = 128      # TPU lane width
_SUBLANE = 8     # f32 sublane count


# ----------------------------------------------------------------------------
# Fused kernel: conv-as-GEMM (BN scale pre-folded) + BN shift + global average
# pool + Linear.  One grid step == one image.
#   p_ref    : (HW, Kpad)      bf16  im2col patches of this image (K zero-padded)
#   w_ref    : (Kpad, Cout)    bf16  conv weights with BN scale folded in
#   shift_ref: (1, Cout)       f32   BN shift (beta - mean*scale)
#   wfc_ref  : (Cout, NCpad)   f32   fc weights, num_class zero-padded to 128
#   bfc_ref  : (1, NCpad)      f32   fc bias, zero-padded
#   out_ref  : (1, 8, NCpad)   f32   logits broadcast over 8 sublanes
# ----------------------------------------------------------------------------
def fused_conv_bn_pool_fc_kernel(p_ref, w_ref, shift_ref, wfc_ref, bfc_ref,
                                 out_ref, *, inv_hw):
    # conv as GEMM, f32 accumulation on the MXU
    acc = jnp.dot(p_ref[...], w_ref[...],
                  preferred_element_type=jnp.float32)            # (HW, Cout) f32

    # global average pool over spatial positions; BN shift commutes with the
    # mean (pooling is linear), so it is added once to the pooled row.
    pooled = jnp.sum(acc, axis=0, keepdims=True) * inv_hw + shift_ref[...]  # (1, Cout)

    # tiny fc: broadcast pooled row over 8 sublanes so the store is an
    # unmasked (8, 128) tile.
    pooled8 = jnp.broadcast_to(pooled, (_SUBLANE, pooled.shape[1]))          # (8, Cout)
    logits = jnp.dot(pooled8, wfc_ref[...],
                     preferred_element_type=jnp.float32) + bfc_ref[...]      # (8, NCpad)
    out_ref[...] = logits[None, :, :].astype(out_ref.dtype)                  # (1, 8, NCpad)


# ----------------------------------------------------------------------------
# End-to-end `proposed.forward` (pre_conv stage -> pool -> fc), wrapper glue.
# ----------------------------------------------------------------------------
def proposed_forward(x_nchw, params, eps=1e-5):
    conv_w = params["conv_w"]                          # (Cout, Cin, 3, 3) OIHW
    gamma, beta = params["bn_gamma"], params["bn_beta"]
    mean, var = params["bn_mean"], params["bn_var"]
    wfc, bfc = params["fc_w"], params["fc_b"]          # (Cout, nc), (nc,)

    x = jnp.transpose(x_nchw, (0, 2, 3, 1)).astype(jnp.float32)  # NCHW -> NHWC
    N, H, W, Cin = x.shape
    Cout = conv_w.shape[0]
    HW = H * W
    K = 9 * Cin
    Kpad = ((K + _LANE - 1) // _LANE) * _LANE          # zero-pad K to lane width

    # --- glue: im2col (3x3, stride 1, pad 1) -> (N*HW, Kpad) bf16 ---
    xp = jnp.pad(x, ((0, 0), (1, 1), (1, 1), (0, 0)))
    taps = [xp[:, ky:ky + H, kx:kx + W, :] for ky in range(3) for kx in range(3)]
    patches = jnp.stack(taps, axis=-2).reshape(N * HW, K)        # (N*HW, 9*Cin)
    patches = jnp.pad(patches, ((0, 0), (0, Kpad - K))).astype(jnp.bfloat16)

    # --- glue: weight OIHW -> (9*Cin, Cout), fold BN scale into weights ---
    inv_std = 1.0 / jnp.sqrt(var + eps)
    scale = gamma * inv_std                                      # (Cout,)
    shift = (beta - mean * scale).reshape(1, Cout).astype(jnp.float32)
    w_mat = jnp.transpose(conv_w, (2, 3, 1, 0)).reshape(K, Cout) * scale[None, :]
    w_mat = jnp.pad(w_mat, ((0, Kpad - K), (0, 0))).astype(jnp.bfloat16)

    # --- glue: fc padded to lane-dense output columns ---
    num_class = wfc.shape[1]
    NCpad = ((num_class + _LANE - 1) // _LANE) * _LANE
    wfc_pad = jnp.pad(wfc.astype(jnp.float32), ((0, 0), (0, NCpad - num_class)))
    bfc_pad = jnp.pad(bfc.astype(jnp.float32),
                      (0, NCpad - num_class)).reshape(1, NCpad)

    kernel = functools.partial(fused_conv_bn_pool_fc_kernel, inv_hw=1.0 / HW)

    out = pl.pallas_call(
        kernel,
        out_shape=jax.ShapeDtypeStruct((N, _SUBLANE, NCpad), jnp.float32),
        grid=(N,),
        in_specs=[
            pl.BlockSpec((HW, Kpad), lambda n: (n, 0)),      # this image's patches
            pl.BlockSpec((Kpad, Cout), lambda n: (0, 0)),    # conv weights (resident)
            pl.BlockSpec((1, Cout), lambda n: (0, 0)),       # BN shift
            pl.BlockSpec((Cout, NCpad), lambda n: (0, 0)),   # fc weights (resident)
            pl.BlockSpec((1, NCpad), lambda n: (0, 0)),      # fc bias
        ],
        out_specs=pl.BlockSpec((1, _SUBLANE, NCpad), lambda n: (n, 0, 0)),
        compiler_params=pltpu.CompilerParams(
            dimension_semantics=("parallel",)),              # megacore over images
    )(patches, w_mat, shift, wfc_pad, bfc_pad)

    return out[:, 0, :num_class]                             # (N, num_class)


# ----------------------------------------------------------------------------
# Pure-JAX (f32) reference for a sanity check of the implemented path.
# ----------------------------------------------------------------------------
def _reference_forward(x_nchw, params, eps=1e-5):
    y = jax.lax.conv_general_dilated(
        x_nchw.astype(jnp.float32), params["conv_w"].astype(jnp.float32),
        window_strides=(1, 1), padding=((1, 1), (1, 1)),
        dimension_numbers=("NCHW", "OIHW", "NCHW"))
    inv_std = 1.0 / jnp.sqrt(params["bn_var"] + eps)
    scale = params["bn_gamma"] * inv_std
    shift = params["bn_beta"] - params["bn_mean"] * scale
    y = y * scale[None, :, None, None] + shift[None, :, None, None]
    pooled = jnp.mean(y, axis=(2, 3))                        # (N, Cout)
    return pooled @ params["fc_w"] + params["fc_b"]


if __name__ == "__main__":
    # CIFAR-like RGB input at small spatial size (Cin=3 is fixed by the module).
    N, Cin, H, W = 2, 3, 16, 16
    Cout = 128            # stage_channel[0] after the "[128] + 2*rest" rewrite
    num_class = 10

    key = jax.random.PRNGKey(0)
    kx, kw, kg, kb, km, kv, kfw, kfb = jax.random.split(key, 8)

    x = jax.random.normal(kx, (N, Cin, H, W), jnp.float32)

    params = {
        # Conv2d(3, 128, kernel=3, stride=1, pad=1, bias=False) — OIHW
        "conv_w": jax.random.normal(kw, (Cout, Cin, 3, 3), jnp.float32) * 0.1,
        # BatchNorm2d(128) — inference-mode running stats
        "bn_gamma": 1.0 + 0.1 * jax.random.normal(kg, (Cout,), jnp.float32),
        "bn_beta": 0.1 * jax.random.normal(kb, (Cout,), jnp.float32),
        "bn_mean": 0.05 * jax.random.normal(km, (Cout,), jnp.float32),
        "bn_var": jnp.abs(1.0 + 0.1 * jax.random.normal(kv, (Cout,), jnp.float32)),
        # Linear(128, 10), stored as (in, out)  (original was Linear(1024, 10))
        "fc_w": jax.random.normal(kfw, (Cout, num_class), jnp.float32) * 0.05,
        "fc_b": jax.random.normal(kfb, (num_class,), jnp.float32) * 0.05,
    }

    logits = jax.jit(proposed_forward)(x, params)
    jax.block_until_ready(logits)
    assert logits.shape == (N, num_class) and logits.dtype == jnp.float32

    ref = _reference_forward(x, params)
    max_err = float(jnp.max(jnp.abs(logits - ref)))
    assert max_err < 5e-2, f"mismatch vs reference: {max_err}"  # bf16 GEMM, f32 acc

    print("KERNEL_OK")
</pallas_src>

<mosaic_0001>
module attributes {stable_mosaic.version = 11 : i64} {
  func.func @fused_conv_bn_pool_fc_kernel(%arg0: i32, %arg1: memref<256x128xbf16, #tpu.memory_space<vmem>>, %arg2: memref<128x128xbf16, #tpu.memory_space<vmem>>, %arg3: memref<1x128xf32, #tpu.memory_space<vmem>>, %arg4: memref<128x128xf32, #tpu.memory_space<vmem>>, %arg5: memref<1x128xf32, #tpu.memory_space<vmem>>, %arg6: memref<1x8x128xf32, #tpu.memory_space<vmem>>) attributes {dimension_semantics = [#tpu.dimension_semantics<parallel>], iteration_bounds = array<i64: 2>, scalar_prefetch = 0 : i64, scratch_operands = 0 : i64, tpu.core_type = #tpu.core_type<tc>, window_params = [{transform_indices = @transform_0, window_bounds = array<i64: 256, 128>}, {pipeline_mode = #tpu.pipeline_mode<synchronous>, transform_indices = @transform_1, window_bounds = array<i64: 128, 128>}, {pipeline_mode = #tpu.pipeline_mode<synchronous>, transform_indices = @transform_2, window_bounds = array<i64: 1, 128>}, {pipeline_mode = #tpu.pipeline_mode<synchronous>, transform_indices = @transform_3, window_bounds = array<i64: 128, 128>}, {pipeline_mode = #tpu.pipeline_mode<synchronous>, transform_indices = @transform_4, window_bounds = array<i64: 1, 128>}, {transform_indices = @transform_5, window_bounds = array<i64: 1, 8, 128>}]} {
    %c0 = arith.constant 0 : index
    %c0_0 = arith.constant 0 : index
    %0 = vector.load %arg1[%c0, %c0_0] : memref<256x128xbf16, #tpu.memory_space<vmem>>, vector<256x128xbf16>
    %c0_1 = arith.constant 0 : index
    %c0_2 = arith.constant 0 : index
    %1 = vector.load %arg2[%c0_1, %c0_2] : memref<128x128xbf16, #tpu.memory_space<vmem>>, vector<128x128xbf16>
    %cst = arith.constant dense<0.000000e+00> : vector<256x128xf32>
    %2 = tpu.matmul %0, %1, %cst {dimension_numbers = #tpu.dot_dimension_numbers<[1], [0], [0], [1], [0, 0, 1, 1], [], []>} : vector<256x128xbf16>, vector<128x128xbf16>, vector<256x128xf32> -> vector<256x128xf32>
    %cst_3 = arith.constant dense<0.000000e+00> : vector<128xf32>
    %3 = vector.multi_reduction <add>, %2, %cst_3 [0] : vector<256x128xf32> to vector<128xf32>
    %4 = vector.shape_cast %3 : vector<128xf32> to vector<1x128xf32>
    %cst_4 = arith.constant 3.906250e-03 : f32
    %5 = vector.broadcast %cst_4 : f32 to vector<1x128xf32>
    %6 = arith.mulf %4, %5 : vector<1x128xf32>
    %c0_5 = arith.constant 0 : index
    %c0_6 = arith.constant 0 : index
    %7 = vector.load %arg3[%c0_5, %c0_6] : memref<1x128xf32, #tpu.memory_space<vmem>>, vector<1x128xf32>
    %8 = arith.addf %6, %7 : vector<1x128xf32>
    %9 = vector.shape_cast %8 : vector<1x128xf32> to vector<1x128xf32>
    %10 = vector.broadcast %9 : vector<1x128xf32> to vector<8x128xf32>
    %c0_7 = arith.constant 0 : index
    %c0_8 = arith.constant 0 : index
    %11 = vector.load %arg4[%c0_7, %c0_8] : memref<128x128xf32, #tpu.memory_space<vmem>>, vector<128x128xf32>
    %cst_9 = arith.constant dense<0.000000e+00> : vector<8x128xf32>
    %12 = tpu.matmul %10, %11, %cst_9 {dimension_numbers = #tpu.dot_dimension_numbers<[1], [0], [0], [1], [0, 0, 1, 1], [], []>} : vector<8x128xf32>, vector<128x128xf32>, vector<8x128xf32> -> vector<8x128xf32>
    %c0_10 = arith.constant 0 : index
    %c0_11 = arith.constant 0 : index
    %13 = vector.load %arg5[%c0_10, %c0_11] : memref<1x128xf32, #tpu.memory_space<vmem>>, vector<1x128xf32>
    %14 = vector.broadcast %13 : vector<1x128xf32> to vector<8x128xf32>
    %15 = arith.addf %12, %14 : vector<8x128xf32>
    %16 = vector.shape_cast %15 : vector<8x128xf32> to vector<1x8x128xf32>
    %c0_12 = arith.constant 0 : index
    %c0_13 = arith.constant 0 : index
    %c0_14 = arith.constant 0 : index
    %17 = vector.load %arg6[%c0_12, %c0_13, %c0_14] : memref<1x8x128xf32, #tpu.memory_space<vmem>>, vector<1x8x128xf32>
    tpu.vector_store %arg6[%c0_12, %c0_13, %c0_14], %16 {strides = array<i32>} : memref<1x8x128xf32, #tpu.memory_space<vmem>>, vector<1x8x128xf32>,
    return
  }
  func.func @transform_0(%arg0: i32) -> (i32, i32) {
    %c0_i32 = arith.constant 0 : i32
    %c0_i32_0 = arith.constant 0 : i32
    return %arg0, %c0_i32 : i32, i32
  }
  func.func @transform_1(%arg0: i32) -> (i32, i32) {
    %c0_i32 = arith.constant 0 : i32
    %c0_i32_0 = arith.constant 0 : i32
    %c0_i32_1 = arith.constant 0 : i32
    return %c0_i32, %c0_i32_0 : i32, i32
  }
  func.func @transform_2(%arg0: i32) -> (i32, i32) {
    %c0_i32 = arith.constant 0 : i32
    %c0_i32_0 = arith.constant 0 : i32
    %c0_i32_1 = arith.constant 0 : i32
    return %c0_i32, %c0_i32_0 : i32, i32
  }
  func.func @transform_3(%arg0: i32) -> (i32, i32) {
    %c0_i32 = arith.constant 0 : i32
    %c0_i32_0 = arith.constant 0 : i32
    %c0_i32_1 = arith.constant 0 : i32
    return %c0_i32, %c0_i32_0 : i32, i32
  }
  func.func @transform_4(%arg0: i32) -> (i32, i32) {
    %c0_i32 = arith.constant 0 : i32
    %c0_i32_0 = arith.constant 0 : i32
    %c0_i32_1 = arith.constant 0 : i32
    return %c0_i32, %c0_i32_0 : i32, i32
  }
  func.func @transform_5(%arg0: i32) -> (i32, i32, i32) {
    %c0_i32 = arith.constant 0 : i32
    %c0_i32_0 = arith.constant 0 : i32
    %c0_i32_1 = arith.constant 0 : i32
    return %arg0, %c0_i32, %c0_i32_0 : i32, i32, i32
  }
}

</mosaic_0001>

<bundles_post_ra>
// kernel: proposed_forward.1
= control target key start
LH: loop header
LB: loop body
LE: loop exit
PB: predicated region body
PF: predicated region fallthrough
CT: control target
= control target key end

     0   :  { %s1019_s18 = smov 0   ;;  %s1137_s0 = inlined_call_operand.vmem [shape: bf16[512,128], index: 0, kind: input, shape index: {}]   ;;  %s1138_s1 = inlined_call_operand.vmem [shape: bf16[128,128], index: 1, kind: input, shape index: {}]   ;;  %s1139_s2 = inlined_call_operand.vmem [shape: f32[1,128], index: 2, kind: input, shape index: {}]   ;;  %s1140_s3 = inlined_call_operand.vmem [shape: f32[128,128], index: 3, kind: input, shape index: {}]   ;;  %s1141_s4 = inlined_call_operand.vmem [shape: f32[1,128], index: 4, kind: input, shape index: {}]   ;;  %s1142_s5 = inlined_call_operand.vmem [shape: f32[2,8,128], index: 5, kind: output, shape index: {}]  }
   0x1 LB: > { %s1025_s19 = sadd.s32 4294967295, %s985_s18   ;;  %p774_p0 = scmp.ge.s32.totalorder %s985_s18, 1  ;;  %s985_s18 = sphi %s1019_s18, %s15_s18  }
   0x2   : > { %p188_p1 = scmp.lt.s32.totalorder %s985_s18, 3 }
   0x4   : > { %p189_p2 = pnand %p774_p0, %p188_p1 }
   0x5   : > { %s775_s22 = sshll.u32 (!%p189_p2), %s1025_s19, 5  ;;  %p221_p4 = scmp.lt.s32.totalorder (!%p189_p2), %s1025_s19, 1 }
   0x6   : > { %192 = sbr.rel (%p189_p2) target bundleno = 519 (0x207), region = 40  ;;  %p216_p3 = scmp.lt.s32.totalorder (!%p189_p2), %s775_s22, 63 }
   0xb   : > { %v955_v0 = vld [vmem:[%s1138_s1 + $0x38] sm:$0xff]   ;;  %v956_v1 = vld [vmem:[%s1138_s1 + $0x30] sm:$0xff]   ;;  %s1144_s22 = smov (!%p216_p3, %s775_s22), 63  ;;  %v957_v2 = vld [vmem:[%s1138_s1 + $0x28] sm:$0xff]   ;;  %v987_v24 = vmov 0.0   ;;  %vm988_vm0 = vmmov 0  }
   0xc   : > { %846 = vmatprep.subr.bf16.mxu0 %v955_v0  ;;  %929 = vmatprep.subr.bf16.mxu1 %v955_v0  ;;  %s776_s27 = sshll.u32 %s1144_s22, 2  ;;  %v958_v3 = vld [vmem:[%s1138_s1 + $0x20] sm:$0xff]   ;;  %v959_v5 = vld [vmem:[%s1138_s1 + $0x18] sm:$0xff]   ;;  %v960_v6 = vld [vmem:[%s1138_s1 + $0x10] sm:$0xff]   ;;  %s1146_s19 = smov (!%p221_p4, %s1025_s19), 1 }
   0xd   : > { %847 = vmatpush3.bf16.msra.mxu0 %v955_v0  ;;  %937 = vmatpush3.bf16.msra.mxu1 %v955_v0  ;;  %s1042_s30 = scalar_lea.vmem %s1137_s0, %s776_s27  ;;  %v961_v8 = vld [vmem:[%s1138_s1 + $0x8] sm:$0xff]   ;;  %v962_v9 = vld [vmem:[%s1138_s1] sm:$0xff]   ;;  %v638_v25 = vld [vmem:[%s1140_s3 + $0x78] sm:$0xff]  ;;  %s777_s29 = sshll.u32 %s1146_s19, 3 }
   0xe   : > { %848 = vmatprep.subr.bf16.mxu0 %v956_v1  ;;  %930 = vmatprep.subr.bf16.mxu1 %v956_v1  ;;  %v963_v4 = vld [vmem:[%s1042_s30] sm:$0xff]   ;;  %v964_v10 = vld [vmem:[%s1042_s30 + $0x8] sm:$0xff]   ;;  %v965_v12 = vld [vmem:[%s1042_s30 + $0x10] sm:$0xff]   ;;  %s224_s9 = scalar_lea.vmem %s1142_s5, %s777_s29 }
   0xf   : > { %862 = vmatprep.mubr.bf16.mxu0 %v963_v4  ;;  %v971_v7 = vld [vmem:[%s1042_s30 + $0x40] sm:$0xff]   ;;  %v972_v11 = vld [vmem:[%s1042_s30 + $0x48] sm:$0xff]   ;;  %v973_v13 = vld [vmem:[%s1042_s30 + $0x50] sm:$0xff]  }
  0x10   : > { %878 = vmatprep.mubr.bf16.mxu1 %v971_v7  ;;  %v966_v14 = vld [vmem:[%s1042_s30 + $0x18] sm:$0xff]   ;;  %v967_v16 = vld [vmem:[%s1042_s30 + $0x20] sm:$0xff]   ;;  %v968_v18 = vld [vmem:[%s1042_s30 + $0x28] sm:$0xff]  }
  0x11   : > { %849 = vmatpush3.bf16.msra.mxu0 %v956_v1  ;;  %938 = vmatpush3.bf16.msra.mxu1 %v956_v1  ;;  %v974_v15 = vld [vmem:[%s1042_s30 + $0x58] sm:$0xff]   ;;  %v975_v17 = vld [vmem:[%s1042_s30 + $0x60] sm:$0xff]   ;;  %v976_v19 = vld [vmem:[%s1042_s30 + $0x68] sm:$0xff]  }
  0x12   : > { %850 = vmatprep.subr.bf16.mxu0 %v957_v2  ;;  %931 = vmatprep.subr.bf16.mxu1 %v957_v2  ;;  %v969_v20 = vld [vmem:[%s1042_s30 + $0x30] sm:$0xff]   ;;  %v970_v22 = vld [vmem:[%s1042_s30 + $0x38] sm:$0xff]   ;;  %v636_v27 = vld [vmem:[%s1140_s3 + $0x68] sm:$0xff] }
  0x13   : > { %v977_v21 = vld [vmem:[%s1042_s30 + $0x70] sm:$0xff]   ;;  %v978_v23 = vld [vmem:[%s1042_s30 + $0x78] sm:$0xff]   ;;  %v635_v28 = vld [vmem:[%s1140_s3 + $0x60] sm:$0xff] }
  0x14   : > { %v637_v26 = vld [vmem:[%s1140_s3 + $0x70] sm:$0xff]  ;;  %v634_v29 = vld [vmem:[%s1140_s3 + $0x58] sm:$0xff]  ;;  %v632_v31 = vld [vmem:[%s1140_s3 + $0x48] sm:$0xff] }
  0x15   : > { %851 = vmatpush3.bf16.msra.mxu0 %v957_v2  ;;  %939 = vmatpush3.bf16.msra.mxu1 %v957_v2  ;;  %v633_v30 = vld [vmem:[%s1140_s3 + $0x50] sm:$0xff]  ;;  %v631_v32 = vld [vmem:[%s1140_s3 + $0x40] sm:$0xff]  ;;  %v630_v33 = vld [vmem:[%s1140_s3 + $0x38] sm:$0xff] }
  0x16   : > { %852 = vmatprep.subr.bf16.mxu0 %v958_v3  ;;  %932 = vmatprep.subr.bf16.mxu1 %v958_v3  ;;  %v629_v34 = vld [vmem:[%s1140_s3 + $0x30] sm:$0xff]  ;;  %v628_v35 = vld [vmem:[%s1140_s3 + $0x28] sm:$0xff]  ;;  %v627_v36 = vld [vmem:[%s1140_s3 + $0x20] sm:$0xff] }
  0x17   : > { %v626_v37 = vld [vmem:[%s1140_s3 + $0x18] sm:$0xff]  ;;  %v625_v38 = vld [vmem:[%s1140_s3 + $0x10] sm:$0xff]  ;;  %v624_v39 = vld [vmem:[%s1140_s3 + $0x8] sm:$0xff] }
  0x18   : > { %v623_v40 = vld [vmem:[%s1140_s3] sm:$0xff] }
  0x19   : > { %853 = vmatpush3.bf16.msra.mxu0 %v958_v3  ;;  %940 = vmatpush3.bf16.msra.mxu1 %v958_v3 }
  0x1a   : > { %854 = vmatprep.subr.bf16.mxu0 %v959_v5  ;;  %933 = vmatprep.subr.bf16.mxu1 %v959_v5 }
  0x1d   : > { %855 = vmatpush3.bf16.msra.mxu0 %v959_v5  ;;  %941 = vmatpush3.bf16.msra.mxu1 %v959_v5 }
  0x1e   : > { %856 = vmatprep.subr.bf16.mxu0 %v960_v6  ;;  %934 = vmatprep.subr.bf16.mxu1 %v960_v6 }
  0x21   : > { %857 = vmatpush3.bf16.msra.mxu0 %v960_v6  ;;  %942 = vmatpush3.bf16.msra.mxu1 %v960_v6 }
  0x22   : > { %858 = vmatprep.subr.bf16.mxu0 %v961_v8  ;;  %935 = vmatprep.subr.bf16.mxu1 %v961_v8 }
  0x25   : > { %859 = vmatpush3.bf16.msra.mxu0 %v961_v8  ;;  %943 = vmatpush3.bf16.msra.mxu1 %v961_v8 }
  0x26   : > { %860 = vmatprep.subr.bf16.mxu0 %v962_v9  ;;  %936 = vmatprep.subr.bf16.mxu1 %v962_v9 }
  0x29   : > { %861 = vmatpush3.bf16.msra.mxu0 %v962_v9  ;;  %944 = vmatpush3.bf16.msra.mxu1 %v962_v9 }
  0x2a   : > { %894 = vmatprep.subr.mxu1 %v987_v24 }
  0x2c   : > { %863 = vmatmul.mubr.bf16.vlgmr.msra.gmra.mxu0 %v964_v10  ;;  %879 = vmatmul.mubr.bf16.vlgmr.msra.gmra.mxu1 %v972_v11 }
  0x2d   : > { %866 = vmatprep.mubr.bf16.mxu0 %v965_v12  ;;  %882 = vmatprep.mubr.bf16.mxu1 %v973_v13 }
  0x2e   : > { %895 = vmatpush3.msra.mxu1 %v638_v25 }
  0x2f   : > { %896 = vmatprep.subr.mxu1 %v987_v24 }
  0x30   : > { %897 = vmatpush3.msra.mxu1 %v637_v26 }
  0x31   : > { %898 = vmatprep.subr.mxu1 %v987_v24 }
  0x32   : > { %899 = vmatpush3.msra.mxu1 %v636_v27 }
  0x33   : > { %900 = vmatprep.subr.mxu1 %v987_v24 }
  0x34   : > { %867 = vmatmul.mubr.bf16.gmra.mxu0 %v966_v14  ;;  %883 = vmatmul.mubr.bf16.gmra.mxu1 %v974_v15 }
  0x35   : > { %870 = vmatprep.mubr.bf16.mxu0 %v967_v16  ;;  %886 = vmatprep.mubr.bf16.mxu1 %v975_v17 }
  0x36   : > { %901 = vmatpush3.msra.mxu1 %v635_v28 }
  0x37   : > { %902 = vmatprep.subr.mxu1 %v987_v24 }
  0x38   : > { %903 = vmatpush3.msra.mxu1 %v634_v29 }
  0x39   : > { %904 = vmatprep.subr.mxu1 %v987_v24 }
  0x3a   : > { %905 = vmatpush3.msra.mxu1 %v633_v30 }
  0x3b   : > { %906 = vmatprep.subr.mxu1 %v987_v24 }
  0x3c   : > { %871 = vmatmul.mubr.bf16.gmra.mxu0 %v968_v18  ;;  %887 = vmatmul.mubr.bf16.gmra.mxu1 %v976_v19 }
  0x3d   : > { %874 = vmatprep.mubr.bf16.mxu0 %v969_v20  ;;  %890 = vmatprep.mubr.bf16.mxu1 %v977_v21 }
  0x3e   : > { %907 = vmatpush3.msra.mxu1 %v632_v31 }
  0x3f   : > { %908 = vmatprep.subr.mxu1 %v987_v24 }
  0x40   : > { %909 = vmatpush3.msra.mxu1 %v631_v32 }
  0x41   : > { %910 = vmatprep.subr.mxu1 %v987_v24 }
  0x42   : > { %911 = vmatpush3.msra.mxu1 %v630_v33 }
  0x43   : > { %912 = vmatprep.subr.mxu1 %v987_v24 }
  0x44   : > { %875 = vmatmul.mubr.bf16.gmra.mxu0 %v970_v22  ;;  %891 = vmatmul.mubr.bf16.gmra.mxu1 %v978_v23 }
  0x45   : > { %913 = vmatpush3.msra.mxu1 %v629_v34  ;;  %926 = vmatprep.mubr.msk.f32.mxu1 %vm988_vm0, %v987_v24 }
  0x46   : > { %914 = vmatprep.subr.mxu1 %v987_v24 }
  0x47   : > { %915 = vmatpush3.msra.mxu1 %v628_v35 }
  0x48   : > { %916 = vmatprep.subr.mxu1 %v987_v24 }
  0x49   : > { %917 = vmatpush3.msra.mxu1 %v627_v36 }
  0x4a   : > { %918 = vmatprep.subr.mxu1 %v987_v24 }
  0x4b   : > { %919 = vmatpush3.msra.mxu1 %v626_v37 }
  0x4c   : > { %920 = vmatprep.subr.mxu1 %v987_v24 }
  0x4d   : > { %921 = vmatpush3.msra.mxu1 %v625_v38 }
  0x4e   : > { %922 = vmatprep.subr.mxu1 %v987_v24 }
  0x4f   : > { %923 = vmatpush3.msra.mxu1 %v624_v39 }
  0x50   : > { %924 = vmatprep.subr.mxu1 %v987_v24 }
  0x51   : > { %925 = vmatpush3.msra.mxu1 %v623_v40 }
  0xec   : > { %v864_v41 = vpop.f32.mrf.mxu0  ;;  %v880_v43 = vpop.f32.mrf.mxu1 }
  0xee   : > { %v452_v42 = vpop.f32.mrf.mxu0  ;;  %v516_v46 = vpop.f32.mrf.mxu1 }
  0xf0   : > { %v865_v44 = vpop.f32.mrf.mxu0  ;;  %v881_v51 = vpop.f32.mrf.mxu1 }
  0xf2   : > { %v455_v45 = vpop.f32.mrf.mxu0  ;;  %v519_v56 = vpop.f32.mrf.mxu1 }
  0xf3   : > { %v579_v47 = vadd.f32 %v455_v45, %v452_v42 }
  0xf4   : > { %v868_v48 = vpop.f32.mrf.mxu0  ;;  %v884_v61 = vpop.f32.mrf.mxu1 }
  0xf5   : > { %v580_v49 = vadd.f32 %v864_v41, %v579_v47 }
  0xf6   : > { %v468_v50 = vpop.f32.mrf.mxu0  ;;  %v532_v2 = vpop.f32.mrf.mxu1 }
  0xf7   : > { %v581_v52 = vadd.f32 %v865_v44, %v580_v49 }
  0xf8   : > { %v869_v53 = vpop.f32.mrf.mxu0  ;;  %v885_v7 = vpop.f32.mrf.mxu1 }
  0xf9   : > { %v582_v54 = vadd.f32 %v581_v52, %v468_v50 }
  0xfa   : > { %v471_v55 = vpop.f32.mrf.mxu0  ;;  %v535_v12 = vpop.f32.mrf.mxu1 }
  0xfb   : > { %v583_v57 = vadd.f32 %v582_v54, %v471_v55 }
  0xfc   : > { %v872_v58 = vpop.f32.mrf.mxu0  ;;  %v888_v15 = vpop.f32.mrf.mxu1 }
  0xfd   : > { %v584_v59 = vadd.f32 %v868_v48, %v583_v57  ;;  %v617_v48 = vld [vmem:[%s1139_s2] sm:$0x1] }
  0xfe   : > { %v484_v60 = vpop.f32.mrf.mxu0  ;;  %v548_v18 = vpop.f32.mrf.mxu1 }
  0xff   : > { %v585_v62 = vadd.f32 %v869_v53, %v584_v59  ;;  %v802_v53 = vld [vmem:[%s1141_s4] ss:$0 sm:$0xff] }
 0x100   : > { %v873_v63 = vpop.f32.mrf.mxu0  ;;  %v889_v21 = vpop.f32.mrf.mxu1 }
 0x101   : > { %v586_v0 = vadd.f32 %v585_v62, %v484_v60 }
 0x102   : > { %v487_v1 = vpop.f32.mrf.mxu0  ;;  %v551_v24 = vpop.f32.mrf.mxu1 }
 0x103   : > { %v587_v3 = vadd.f32 %v586_v0, %v487_v1 }
 0x104   : > { %v876_v4 = vpop.f32.mrf.mxu0  ;;  %v892_v27 = vpop.f32.mrf.mxu1 }
 0x105   : > { %v588_v5 = vadd.f32 %v872_v58, %v587_v3 }
 0x106   : > { %v500_v6 = vpop.f32.mrf.mxu0  ;;  %v564_v30 = vpop.f32.mrf.mxu1 }
 0x107   : > { %v589_v8 = vadd.f32 %v873_v63, %v588_v5 }
 0x108   : > { %v877_v9 = vpop.f32.mrf.mxu0  ;;  %v893_v33 = vpop.f32.mrf.mxu1 }
 0x109   : > { %v590_v10 = vadd.f32 %v589_v8, %v500_v6 }
 0x10a   : > { %v503_v11 = vpop.f32.mrf.mxu0  ;;  %v567_v36 = vpop.f32.mrf.mxu1 }
 0x10b   : > { %v591_v13 = vadd.f32 %v590_v10, %v503_v11 }
 0x10d   : > { %v592_v14 = vadd.f32 %v876_v4, %v591_v13 }
 0x10f   : > { %v593_v16 = vadd.f32 %v877_v9, %v592_v14 }
 0x111   : > { %v594_v17 = vadd.f32 %v593_v16, %v516_v46 }
 0x113   : > { %v595_v19 = vadd.f32 %v594_v17, %v519_v56 }
 0x115   : > { %v596_v20 = vadd.f32 %v880_v43, %v595_v19  ;;  %v619_v43 = vlaneseq }
 0x117   : > { %v597_v22 = vadd.f32 %v881_v51, %v596_v20  ;;  %v620_v46 = vshrl.u32 %v619_v43, 7 }
 0x119   : > { %v598_v23 = vadd.f32 %v597_v22, %v532_v2  ;;  %v621_v50 = vsub.s32 0, %v620_v46 }
 0x11b   : > { %v599_v25 = vadd.f32 %v598_v23, %v535_v12 }
 0x11d   : > { %v600_v26 = vadd.f32 %v884_v61, %v599_v25 }
 0x11f   : > { %v601_v28 = vadd.f32 %v885_v7, %v600_v26 }
 0x121   : > { %v602_v29 = vadd.f32 %v601_v28, %v548_v18 }
 0x123   : > { %v603_v31 = vadd.f32 %v602_v29, %v551_v24 }
 0x125   : > { %v604_v32 = vadd.f32 %v888_v15, %v603_v31 }
 0x127   : > { %v605_v34 = vadd.f32 %v889_v21, %v604_v32 }
 0x129   : > { %v606_v35 = vadd.f32 %v605_v34, %v564_v30 }
 0x12b   : > { %v607_v37 = vadd.f32 %v606_v35, %v567_v36 }
 0x12d   : > { %v608_v38 = vadd.f32 %v892_v27, %v607_v37 }
 0x12f   : > { %v609_v39 = vadd.f32 %v893_v33, %v608_v38 }
 0x131   : > { %v610_v40 = vrot.slane %v609_v39, 4 }
 0x133   : > { %v611_v41 = vadd.f32 %v610_v40, %v609_v39 }
 0x135   : > { %v612_v42 = vrot.slane %v611_v41, 2 }
 0x137   : > { %v613_v44 = vadd.f32 %v612_v42, %v611_v41 }
 0x139   : > { %v614_v45 = vrot.slane %v613_v44, 1 }
 0x13b   : > { %v615_v47 = vadd.f32 %v614_v45, %v613_v44 }
 0x13d   : > { %v616_v49 = vmul.f32 0.00390625, %v615_v47 }
 0x13f   : > { %v618_v51 = vadd.f32 %v617_v48, %v616_v49 }
 0x141   : > { %v622_v52 = vrot.slane %v618_v51, %v621_v50 }
 0x143   : > { %927 = vmatmul.mubr.f32.vlgmr.msra.gmra.mxu1 %v622_v52 }
 0x203   : > { %v712_v54 = vpop.f32.mrf.mxu1 }
 0x204   : > { %v713_v55 = vadd.f32 %v802_v53, %v712_v54 }
 0x205   : > { %v928_v56 = vpop.f32.mrf.mxu1 }
 0x206   : > { %716 = vst [vmem:[%s224_s9] sm:$0xff] %v713_v55 }
 0x207 PF: > { %s15_s18 = sadd.s32 1, %s985_s18  }
 0x208   : > { %p12_p5 = scmp.ge.s32.totalorder %s15_s18, 4  }
 0x20a   :  { %14 = sbr.rel (!%p12_p5) target bundleno = 1 (0x1), region = 70 }

</bundles_post_ra>
